<compile_context>
chip_gen: v7x
topology: tpu7x:2x2x1
jax: 0.10.0
libtpu: 0.0.40
codegen_flags: <defaults>
</compile_context>

<pallas_src>
import jax
import jax.numpy as jnp
from jax.experimental import pallas as pl
from jax.experimental.pallas import tpu as pltpu

# ----------------------------- sizes (small, self-consistent) ---------------
B = 4        # number of graphs (batch)
N = 8        # nodes per graph
E = 16       # edges per graph
DN = 32      # node feature dim
DE = 16      # edge feature dim
H = 32       # hidden dim of flow MLPs
F = 32       # output dim of flow MLPs
H2 = 32      # hidden dim of node MLP
DOUT = 32    # output node dim

# ---- lane-dense packed parameter slab layout (rows x 128 lanes, f32) --------
LANES = 128
R_W1X = 0                   # rows [0, DN)        lanes [0:2H)      w1x fused
#                             rows [0, H2)        lanes [2H:2H+DOUT) wn2
R_W1E = R_W1X + DN          # rows [DN, DN+DE)    lanes [0:2H)      w1e fused
R_W2 = R_W1E + DE           # rows [., .+2H)      lanes [0:2F)      w2 block-diag
#                             rows [., .+2F)      lanes [2H:2H+H2)  wn1 stacked
R_B = R_W2 + 2 * H          # 4 bias rows at lane offset 0
WROWS = R_B + 8             # pad to a multiple of 8 sublanes -> (120, 128)

assert 2 * H == 2 * F
assert 2 * H + max(DOUT, H2) <= LANES and 2 * F <= LANES
assert H2 <= DN and WROWS % 8 == 0


# ----------------------------- Pallas kernel --------------------------------
def _node_update_kernel(eit_ref, x_ref, ea_ref, w_ref, out_ref):
    f32 = jnp.float32
    x = x_ref[0]                  # (Nf, DN)  Nf = Bt*N flattened nodes
    ea = ea_ref[0]                # (Ef, DE)  Ef = Bt*E flattened edges
    eit = eit_ref[0]              # (Ef, 2) int32, node ids already offset by graph*N
    nf = x.shape[0]
    ef = ea.shape[0]

    row_c = eit[:, 0:1]           # (Ef, 1) global target node per edge
    col_c = eit[:, 1:2]           # (Ef, 1) global source node per edge

    # Gather / scatter one-hots built in-kernel (VPU iota+compare); global node
    # ids make them block-diagonal over the graphs in this step.  Directional
    # masks are folded straight into the scatter one-hots.
    node_lanes = jax.lax.broadcasted_iota(jnp.int32, (ef, nf), 1)
    a_col = (node_lanes == col_c).astype(f32)                      # (Ef, Nf)
    hit_row = node_lanes == row_c                                   # (Ef, Nf)
    s_in = jnp.logical_and(hit_row, row_c > col_c).astype(f32)      # scatter^T, row>col
    s_out = jnp.logical_and(hit_row, row_c < col_c).astype(f32)     # scatter^T, row<col

    # TODO(synk): at production N/E replace the one-hot gather matmul with a
    # scalar-prefetch (pl.Element / SMEM-indexed DMA) gather; O(E*N*DN) FLOPs
    # is only acceptable at these toy sizes.
    xg = jnp.dot(a_col, x, preferred_element_type=f32)              # (Ef, DN) == x[col]

    # Packed parameters: static slices of the single resident lane-dense slab.
    w1x = w_ref[R_W1X:R_W1X + DN, 0:2 * H]                 # (DN, 2H) [in | out]
    wn2 = w_ref[R_W1X:R_W1X + H2, 2 * H:2 * H + DOUT]      # (H2, DOUT)
    w1e = w_ref[R_W1E:R_W1E + DE, 0:2 * H]                 # (DE, 2H)
    w2 = w_ref[R_W2:R_W2 + 2 * H, 0:2 * F]                 # (2H, 2F) block-diagonal
    wn1a = w_ref[R_W2:R_W2 + F, 2 * H:2 * H + H2]          # (F, H2)  for flow_in
    wn1b = w_ref[R_W2 + F:R_W2 + 2 * F, 2 * H:2 * H + H2]  # (F, H2)  for flow_out
    b1 = w_ref[R_B:R_B + 1, 0:2 * H]                       # (1, 2H)
    b2 = w_ref[R_B + 1:R_B + 2, 0:2 * F]                   # (1, 2F)
    bn1 = w_ref[R_B + 2:R_B + 3, 0:H2]                     # (1, H2)
    bn2 = w_ref[R_B + 3:R_B + 4, 0:DOUT]                   # (1, DOUT)

    # Fused flow_in / flow_out MLPs: [xg, ea] @ W1 == xg @ W1x + ea @ W1e, with
    # the twin MLPs packed side-by-side (block-diagonal W2).
    # TODO(synk): cast matmul operands to bfloat16 once the MLP dims reach 128+.
    h = jnp.dot(xg, w1x, preferred_element_type=f32)
    h = h + jnp.dot(ea, w1e, preferred_element_type=f32) + b1
    h = jnp.maximum(h, 0.0)                                         # (Ef, 2H)
    f = jnp.dot(h, w2, preferred_element_type=f32) + b2
    f = jnp.maximum(f, 0.0)                                         # (Ef, 2F) = [f_in | f_out]

    # Direction-masked scatter-sum: contract the edge (sublane) axis of the
    # masked one-hots with the matching half of f.
    dnums = (((0,), (0,)), ((), ()))
    agg_in = jax.lax.dot_general(s_in, f[:, 0:F], dnums,
                                 preferred_element_type=f32)        # (Nf, F)
    agg_out = jax.lax.dot_general(s_out, f[:, F:2 * F], dnums,
                                  preferred_element_type=f32)       # (Nf, F)

    # node_mlp([flow_in, flow_out]) with the concat folded into split Wn1.
    hn = jnp.dot(agg_in, wn1a, preferred_element_type=f32)
    hn = hn + jnp.dot(agg_out, wn1b, preferred_element_type=f32) + bn1
    hn = jnp.maximum(hn, 0.0)                                       # (Nf, H2)
    # TODO(synk): DOUT=32 (<128 lanes) => masked partial stores; keep the output
    # last dim a multiple of 128 (or write a flattened lane-dense slab) at scale.
    out_ref[0] = jnp.dot(hn, wn2, preferred_element_type=f32) + bn2


# ----------------------------- parameter packing -----------------------------
def pack_params(p):
    f32 = jnp.float32
    w1x_f = jnp.concatenate([p["w1x_i"], p["w1x_o"]], axis=1)           # (DN, 2H)
    w1e_f = jnp.concatenate([p["w1e_i"], p["w1e_o"]], axis=1)           # (DE, 2H)
    zHF = jnp.zeros((H, F), f32)
    w2_f = jnp.concatenate(
        [jnp.concatenate([p["w2_i"], zHF], axis=1),
         jnp.concatenate([zHF, p["w2_o"]], axis=1)], axis=0)            # (2H, 2F)
    wn1_f = jnp.concatenate([p["wn1a"], p["wn1b"]], axis=0)             # (2F, H2)
    b1_f = jnp.concatenate([p["b1_i"], p["b1_o"]], axis=1)              # (1, 2H)
    b2_f = jnp.concatenate([p["b2_i"], p["b2_o"]], axis=1)              # (1, 2F)

    w = jnp.zeros((WROWS, LANES), f32)
    w = w.at[R_W1X:R_W1X + DN, 0:2 * H].set(w1x_f)
    w = w.at[R_W1X:R_W1X + H2, 2 * H:2 * H + DOUT].set(p["wn2"].astype(f32))
    w = w.at[R_W1E:R_W1E + DE, 0:2 * H].set(w1e_f)
    w = w.at[R_W2:R_W2 + 2 * H, 0:2 * F].set(w2_f)
    w = w.at[R_W2:R_W2 + 2 * F, 2 * H:2 * H + H2].set(wn1_f)
    w = w.at[R_B:R_B + 1, 0:2 * H].set(b1_f)
    w = w.at[R_B + 1:R_B + 2, 0:2 * F].set(b2_f)
    w = w.at[R_B + 2:R_B + 3, 0:H2].set(p["bn1"].astype(f32))
    w = w.at[R_B + 3:R_B + 4, 0:DOUT].set(p["bn2"].astype(f32))
    return w.astype(f32)


# ----------------------------- wrapper ---------------------------------------
def _default_num_steps(nb):
    """v7x-class chips have 2 TensorCores -> 2 parallel grid steps; else 1."""
    try:
        kind = jax.devices()[0].device_kind.lower()
    except Exception:
        kind = ""
    if ("v7" in kind or "7x" in kind) and nb % 2 == 0:
        return 2
    return 1


def time_aware_node_model(x, edge_index, edge_attr, params, num_steps=None):
    """x: (B,N,DN) f32, edge_index: (B,2,E) int32 [row;col], edge_attr: (B,E,DE) f32."""
    nb, n, dn = x.shape
    e = edge_index.shape[-1]
    de = edge_attr.shape[-1]
    if num_steps is None:
        num_steps = _default_num_steps(nb)
    assert nb % num_steps == 0
    bt = nb // num_steps                       # graphs per grid step
    nf, ef = bt * n, bt * e                    # flattened nodes / edges per step

    wbuf = pack_params(params)                 # (WROWS, 128): ONE parameter DMA

    # Single edge-index layout: (Ef, 2) per step, per-graph node offsets
    # pre-added so the in-kernel one-hots are block-diagonal over graphs.
    ei = edge_index.astype(jnp.int32)                              # (nb, 2, E)
    offs = (jnp.arange(nb, dtype=jnp.int32) % bt) * n              # in-step graph base
    eit = jnp.swapaxes(ei + offs[:, None, None], 1, 2).reshape(num_steps, ef, 2)

    xs = x.reshape(num_steps, nf, dn)
    eas = edge_attr.reshape(num_steps, ef, de)

    out = pl.pallas_call(
        _node_update_kernel,
        out_shape=jax.ShapeDtypeStruct((num_steps, nf, DOUT), jnp.float32),
        grid=(num_steps,),
        in_specs=[
            pl.BlockSpec((1, ef, 2), lambda s: (s, 0, 0)),         # edge indices
            pl.BlockSpec((1, nf, dn), lambda s: (s, 0, 0)),        # node features
            pl.BlockSpec((1, ef, de), lambda s: (s, 0, 0)),        # edge features
            pl.BlockSpec((WROWS, LANES), lambda s: (0, 0)),        # packed params
        ],
        out_specs=pl.BlockSpec((1, nf, DOUT), lambda s: (s, 0, 0)),
        compiler_params=pltpu.CompilerParams(
            dimension_semantics=("parallel",)),
    )(eit, xs, eas, wbuf)
    return out.reshape(nb, n, DOUT)


# ----------------------------- pure-JAX reference ----------------------------
def reference_forward_single(x, edge_index, edge_attr, params):
    row, col = edge_index[0], edge_index[1]

    def mlp2(inp, w1x, w1e, b1, w2, b2):
        w1 = jnp.concatenate([w1x, w1e], axis=0)
        h = jnp.maximum(inp @ w1 + b1, 0.0)
        return jnp.maximum(h @ w2 + b2, 0.0)

    inp = jnp.concatenate([x[col], edge_attr], axis=1)

    f_out = mlp2(inp, params["w1x_o"], params["w1e_o"], params["b1_o"],
                 params["w2_o"], params["b2_o"])
    m_out = (row < col).astype(jnp.float32)[:, None]
    agg_out = jnp.zeros((x.shape[0], F), jnp.float32).at[row].add(f_out * m_out)

    f_in = mlp2(inp, params["w1x_i"], params["w1e_i"], params["b1_i"],
                params["w2_i"], params["b2_i"])
    m_in = (row > col).astype(jnp.float32)[:, None]
    agg_in = jnp.zeros((x.shape[0], F), jnp.float32).at[row].add(f_in * m_in)

    flow = jnp.concatenate([agg_in, agg_out], axis=1)
    wn1 = jnp.concatenate([params["wn1a"], params["wn1b"]], axis=0)
    h = jnp.maximum(flow @ wn1 + params["bn1"], 0.0)
    return h @ params["wn2"] + params["bn2"]


def reference_forward(x, edge_index, edge_attr, params):
    return jax.vmap(
        lambda xs, es, eas: reference_forward_single(xs, es, eas, params)
    )(x, edge_index, edge_attr)


# ----------------------------- deterministic params --------------------------
def init_params(key):
    ks = jax.random.split(key, 16)
    s = 0.1

    def w(k, shape):
        return (s * jax.random.normal(k, shape)).astype(jnp.float32)

    return {
        # flow_out_mlp: Linear(DN+DE -> H) + ReLU + Linear(H -> F) + ReLU
        "w1x_o": w(ks[0], (DN, H)), "w1e_o": w(ks[1], (DE, H)),
        "b1_o": w(ks[2], (1, H)),
        "w2_o": w(ks[3], (H, F)), "b2_o": w(ks[4], (1, F)),
        # flow_in_mlp
        "w1x_i": w(ks[5], (DN, H)), "w1e_i": w(ks[6], (DE, H)),
        "b1_i": w(ks[7], (1, H)),
        "w2_i": w(ks[8], (H, F)), "b2_i": w(ks[9], (1, F)),
        # node_mlp: Linear(2F -> H2) + ReLU + Linear(H2 -> DOUT)
        "wn1a": w(ks[10], (F, H2)), "wn1b": w(ks[11], (F, H2)),
        "bn1": w(ks[12], (1, H2)),
        "wn2": w(ks[13], (H2, DOUT)), "bn2": w(ks[14], (1, DOUT)),
    }


if __name__ == "__main__":
    key = jax.random.PRNGKey(0)
    k_x, k_e, k_r, k_c, k_p = jax.random.split(key, 5)

    x = jax.random.normal(k_x, (B, N, DN), dtype=jnp.float32)
    edge_attr = jax.random.normal(k_e, (B, E, DE), dtype=jnp.float32)
    row = jax.random.randint(k_r, (B, E), 0, N, dtype=jnp.int32)
    col = jax.random.randint(k_c, (B, E), 0, N, dtype=jnp.int32)
    edge_index = jnp.stack([row, col], axis=1)          # (B, 2, E)

    params = init_params(k_p)

    out = time_aware_node_model(x, edge_index, edge_attr, params)
    out = jax.block_until_ready(out)

    ref = reference_forward(x, edge_index, edge_attr, params)
    assert out.shape == (B, N, DOUT)
    assert jnp.allclose(out, ref, rtol=1e-4, atol=1e-4), "mismatch vs reference"

    print("KERNEL_OK")
</pallas_src>

<mosaic_0001>
module attributes {stable_mosaic.version = 11 : i64} {
  func.func @_node_update_kernel(%arg0: i32, %arg1: memref<1x64x2xi32, #tpu.memory_space<vmem>>, %arg2: memref<1x32x32xf32, #tpu.memory_space<vmem>>, %arg3: memref<1x64x16xf32, #tpu.memory_space<vmem>>, %arg4: memref<120x128xf32, #tpu.memory_space<vmem>>, %arg5: memref<1x32x32xf32, #tpu.memory_space<vmem>>) attributes {dimension_semantics = [#tpu.dimension_semantics<parallel>], iteration_bounds = array<i64: 1>, scalar_prefetch = 0 : i64, scratch_operands = 0 : i64, tpu.core_type = #tpu.core_type<tc>, window_params = [{transform_indices = @transform_0, window_bounds = array<i64: 1, 64, 2>}, {transform_indices = @transform_1, window_bounds = array<i64: 1, 32, 32>}, {transform_indices = @transform_2, window_bounds = array<i64: 1, 64, 16>}, {pipeline_mode = #tpu.pipeline_mode<synchronous>, transform_indices = @transform_3, window_bounds = array<i64: 120, 128>}, {transform_indices = @transform_4, window_bounds = array<i64: 1, 32, 32>}]} {
    %c0 = arith.constant 0 : index
    %c0_0 = arith.constant 0 : index
    %c0_1 = arith.constant 0 : index
    %0 = vector.load %arg2[%c0, %c0_0, %c0_1] : memref<1x32x32xf32, #tpu.memory_space<vmem>>, vector<1x32x32xf32>
    %1 = vector.shape_cast %0 : vector<1x32x32xf32> to vector<32x32xf32>
    %c0_2 = arith.constant 0 : index
    %c0_3 = arith.constant 0 : index
    %c0_4 = arith.constant 0 : index
    %2 = vector.load %arg3[%c0_2, %c0_3, %c0_4] : memref<1x64x16xf32, #tpu.memory_space<vmem>>, vector<1x64x16xf32>
    %3 = vector.shape_cast %2 : vector<1x64x16xf32> to vector<64x16xf32>
    %c0_5 = arith.constant 0 : index
    %c0_6 = arith.constant 0 : index
    %c0_7 = arith.constant 0 : index
    %4 = vector.load %arg1[%c0_5, %c0_6, %c0_7] : memref<1x64x2xi32, #tpu.memory_space<vmem>>, vector<1x64x2xi32>
    %5 = vector.shape_cast %4 : vector<1x64x2xi32> to vector<64x2xi32>
    %6 = vector.extract_strided_slice %5 {offsets = [0, 0], sizes = [64, 1], strides = [1, 1]} : vector<64x2xi32> to vector<64x1xi32>
    %7 = vector.extract_strided_slice %5 {offsets = [0, 1], sizes = [64, 1], strides = [1, 1]} : vector<64x2xi32> to vector<64x1xi32>
    %8 = tpu.iota {dimensions = array<i32: 1>} : vector<64x32xi32>
    %9 = vector.broadcast %7 : vector<64x1xi32> to vector<64x32xi32>
    %10 = arith.cmpi eq, %8, %9 : vector<64x32xi32>
    %11 = arith.extui %10 : vector<64x32xi1> to vector<64x32xi32>
    %12 = arith.sitofp %11 : vector<64x32xi32> to vector<64x32xf32>
    %13 = vector.broadcast %6 : vector<64x1xi32> to vector<64x32xi32>
    %14 = arith.cmpi eq, %8, %13 : vector<64x32xi32>
    %15 = arith.cmpi sgt, %6, %7 : vector<64x1xi32>
    %16 = vector.broadcast %15 : vector<64x1xi1> to vector<64x32xi1>
    %17 = arith.andi %14, %16 : vector<64x32xi1>
    %18 = arith.extui %17 : vector<64x32xi1> to vector<64x32xi32>
    %19 = arith.sitofp %18 : vector<64x32xi32> to vector<64x32xf32>
    %20 = arith.cmpi slt, %6, %7 : vector<64x1xi32>
    %21 = vector.broadcast %20 : vector<64x1xi1> to vector<64x32xi1>
    %22 = arith.andi %14, %21 : vector<64x32xi1>
    %23 = arith.extui %22 : vector<64x32xi1> to vector<64x32xi32>
    %24 = arith.sitofp %23 : vector<64x32xi32> to vector<64x32xf32>
    %cst = arith.constant dense<0.000000e+00> : vector<64x32xf32>
    %25 = tpu.matmul %12, %1, %cst {dimension_numbers = #tpu.dot_dimension_numbers<[1], [0], [0], [1], [0, 0, 1, 1], [], []>} : vector<64x32xf32>, vector<32x32xf32>, vector<64x32xf32> -> vector<64x32xf32>
    %c0_8 = arith.constant 0 : index
    %c0_9 = arith.constant 0 : index
    %26 = vector.load %arg4[%c0_8, %c0_9] : memref<120x128xf32, #tpu.memory_space<vmem>>, vector<32x64xf32>
    %c0_10 = arith.constant 0 : index
    %c64 = arith.constant 64 : index
    %27 = vector.load %arg4[%c0_10, %c64] : memref<120x128xf32, #tpu.memory_space<vmem>>, vector<32x32xf32>
    %c32 = arith.constant 32 : index
    %c0_11 = arith.constant 0 : index
    %28 = vector.load %arg4[%c32, %c0_11] : memref<120x128xf32, #tpu.memory_space<vmem>>, vector<16x64xf32>
    %c48 = arith.constant 48 : index
    %c0_12 = arith.constant 0 : index
    %29 = vector.load %arg4[%c48, %c0_12] : memref<120x128xf32, #tpu.memory_space<vmem>>, vector<64x64xf32>
    %c48_13 = arith.constant 48 : index
    %c64_14 = arith.constant 64 : index
    %30 = vector.load %arg4[%c48_13, %c64_14] : memref<120x128xf32, #tpu.memory_space<vmem>>, vector<32x32xf32>
    %c80 = arith.constant 80 : index
    %c64_15 = arith.constant 64 : index
    %31 = vector.load %arg4[%c80, %c64_15] : memref<120x128xf32, #tpu.memory_space<vmem>>, vector<32x32xf32>
    %c112 = arith.constant 112 : index
    %c0_16 = arith.constant 0 : index
    %32 = vector.load %arg4[%c112, %c0_16] : memref<120x128xf32, #tpu.memory_space<vmem>>, vector<1x64xf32>
    %c113 = arith.constant 113 : index
    %c0_17 = arith.constant 0 : index
    %33 = vector.load %arg4[%c113, %c0_17] : memref<120x128xf32, #tpu.memory_space<vmem>>, vector<1x64xf32>
    %c114 = arith.constant 114 : index
    %c0_18 = arith.constant 0 : index
    %34 = vector.load %arg4[%c114, %c0_18] : memref<120x128xf32, #tpu.memory_space<vmem>>, vector<1x32xf32>
    %c115 = arith.constant 115 : index
    %c0_19 = arith.constant 0 : index
    %35 = vector.load %arg4[%c115, %c0_19] : memref<120x128xf32, #tpu.memory_space<vmem>>, vector<1x32xf32>
    %cst_20 = arith.constant dense<0.000000e+00> : vector<64x64xf32>
    %36 = tpu.matmul %25, %26, %cst_20 {dimension_numbers = #tpu.dot_dimension_numbers<[1], [0], [0], [1], [0, 0, 1, 1], [], []>} : vector<64x32xf32>, vector<32x64xf32>, vector<64x64xf32> -> vector<64x64xf32>
    %cst_21 = arith.constant dense<0.000000e+00> : vector<64x64xf32>
    %37 = tpu.matmul %3, %28, %cst_21 {dimension_numbers = #tpu.dot_dimension_numbers<[1], [0], [0], [1], [0, 0, 1, 1], [], []>} : vector<64x16xf32>, vector<16x64xf32>, vector<64x64xf32> -> vector<64x64xf32>
    %38 = arith.addf %36, %37 : vector<64x64xf32>
    %39 = vector.broadcast %32 : vector<1x64xf32> to vector<64x64xf32>
    %40 = arith.addf %38, %39 : vector<64x64xf32>
    %cst_22 = arith.constant 0.000000e+00 : f32
    %41 = vector.broadcast %cst_22 : f32 to vector<64x64xf32>
    %42 = arith.maximumf %40, %41 : vector<64x64xf32>
    %cst_23 = arith.constant dense<0.000000e+00> : vector<64x64xf32>
    %43 = tpu.matmul %42, %29, %cst_23 {dimension_numbers = #tpu.dot_dimension_numbers<[1], [0], [0], [1], [0, 0, 1, 1], [], []>} : vector<64x64xf32>, vector<64x64xf32>, vector<64x64xf32> -> vector<64x64xf32>
    %44 = vector.broadcast %33 : vector<1x64xf32> to vector<64x64xf32>
    %45 = arith.addf %43, %44 : vector<64x64xf32>
    %cst_24 = arith.constant 0.000000e+00 : f32
    %46 = vector.broadcast %cst_24 : f32 to vector<64x64xf32>
    %47 = arith.maximumf %45, %46 : vector<64x64xf32>
    %48 = vector.extract_strided_slice %47 {offsets = [0, 0], sizes = [64, 32], strides = [1, 1]} : vector<64x64xf32> to vector<64x32xf32>
    %cst_25 = arith.constant dense<0.000000e+00> : vector<32x32xf32>
    %49 = tpu.matmul %19, %48, %cst_25 {dimension_numbers = #tpu.dot_dimension_numbers<[0], [0], [1], [1], [0, 1, 1, 1], [], []>} : vector<64x32xf32>, vector<64x32xf32>, vector<32x32xf32> -> vector<32x32xf32>
    %50 = vector.extract_strided_slice %47 {offsets = [0, 32], sizes = [64, 32], strides = [1, 1]} : vector<64x64xf32> to vector<64x32xf32>
    %cst_26 = arith.constant dense<0.000000e+00> : vector<32x32xf32>
    %51 = tpu.matmul %24, %50, %cst_26 {dimension_numbers = #tpu.dot_dimension_numbers<[0], [0], [1], [1], [0, 1, 1, 1], [], []>} : vector<64x32xf32>, vector<64x32xf32>, vector<32x32xf32> -> vector<32x32xf32>
    %cst_27 = arith.constant dense<0.000000e+00> : vector<32x32xf32>
    %52 = tpu.matmul %49, %30, %cst_27 {dimension_numbers = #tpu.dot_dimension_numbers<[1], [0], [0], [1], [0, 0, 1, 1], [], []>} : vector<32x32xf32>, vector<32x32xf32>, vector<32x32xf32> -> vector<32x32xf32>
    %cst_28 = arith.constant dense<0.000000e+00> : vector<32x32xf32>
    %53 = tpu.matmul %51, %31, %cst_28 {dimension_numbers = #tpu.dot_dimension_numbers<[1], [0], [0], [1], [0, 0, 1, 1], [], []>} : vector<32x32xf32>, vector<32x32xf32>, vector<32x32xf32> -> vector<32x32xf32>
    %54 = arith.addf %52, %53 : vector<32x32xf32>
    %55 = vector.broadcast %34 : vector<1x32xf32> to vector<32x32xf32>
    %56 = arith.addf %54, %55 : vector<32x32xf32>
    %cst_29 = arith.constant 0.000000e+00 : f32
    %57 = vector.broadcast %cst_29 : f32 to vector<32x32xf32>
    %58 = arith.maximumf %56, %57 : vector<32x32xf32>
    %cst_30 = arith.constant dense<0.000000e+00> : vector<32x32xf32>
    %59 = tpu.matmul %58, %27, %cst_30 {dimension_numbers = #tpu.dot_dimension_numbers<[1], [0], [0], [1], [0, 0, 1, 1], [], []>} : vector<32x32xf32>, vector<32x32xf32>, vector<32x32xf32> -> vector<32x32xf32>
    %60 = vector.broadcast %35 : vector<1x32xf32> to vector<32x32xf32>
    %61 = arith.addf %59, %60 : vector<32x32xf32>
    %c0_31 = arith.constant 0 : index
    %c0_32 = arith.constant 0 : index
    %c0_33 = arith.constant 0 : index
    %62 = vector.load %arg5[%c0_31, %c0_32, %c0_33] : memref<1x32x32xf32, #tpu.memory_space<vmem>>, vector<1x32x32xf32>
    %63 = vector.shape_cast %62 : vector<1x32x32xf32> to vector<32x32xf32>
    %64 = vector.shape_cast %61 : vector<32x32xf32> to vector<1x32x32xf32>
    tpu.vector_store %arg5[%c0_31, %c0_32, %c0_33], %64 {strides = array<i32>} : memref<1x32x32xf32, #tpu.memory_space<vmem>>, vector<1x32x32xf32>,
    return
  }
  func.func @transform_0(%arg0: i32) -> (i32, i32, i32) {
    %c0_i32 = arith.constant 0 : i32
    %c0_i32_0 = arith.constant 0 : i32
    %c0_i32_1 = arith.constant 0 : i32
    return %arg0, %c0_i32, %c0_i32_0 : i32, i32, i32
  }
  func.func @transform_1(%arg0: i32) -> (i32, i32, i32) {
    %c0_i32 = arith.constant 0 : i32
    %c0_i32_0 = arith.constant 0 : i32
    %c0_i32_1 = arith.constant 0 : i32
    return %arg0, %c0_i32, %c0_i32_0 : i32, i32, i32
  }
  func.func @transform_2(%arg0: i32) -> (i32, i32, i32) {
    %c0_i32 = arith.constant 0 : i32
    %c0_i32_0 = arith.constant 0 : i32
    %c0_i32_1 = arith.constant 0 : i32
    return %arg0, %c0_i32, %c0_i32_0 : i32, i32, i32
  }
  func.func @transform_3(%arg0: i32) -> (i32, i32) {
    %c0_i32 = arith.constant 0 : i32
    %c0_i32_0 = arith.constant 0 : i32
    %c0_i32_1 = arith.constant 0 : i32
    return %c0_i32, %c0_i32_0 : i32, i32
  }
  func.func @transform_4(%arg0: i32) -> (i32, i32, i32) {
    %c0_i32 = arith.constant 0 : i32
    %c0_i32_0 = arith.constant 0 : i32
    %c0_i32_1 = arith.constant 0 : i32
    return %arg0, %c0_i32, %c0_i32_0 : i32, i32, i32
  }
}

</mosaic_0001>

<bundles_post_ra>
// kernel: tpu_custom_call.1
= control target key start
LH: loop header
LB: loop body
LE: loop exit
PB: predicated region body
PF: predicated region fallthrough
CT: control target
= control target key end

     0   :  { %v2089_v2 = vmov 1   ;;  %s2494_s0 = inlined_call_operand.vmem [shape: s32[1,64,2], index: 0, kind: input, shape index: {}]   ;;  %s2495_s1 = inlined_call_operand.vmem [shape: f32[1,32,32], index: 1, kind: input, shape index: {}]   ;;  %s2496_s2 = inlined_call_operand.vmem [shape: f32[1,64,16], index: 2, kind: input, shape index: {}]   ;;  %s2497_s3 = inlined_call_operand.vmem [shape: f32[120,128], index: 3, kind: input, shape index: {}]   ;;  %s2498_s4 = inlined_call_operand.hbm [shape: f32[1,32,32], index: 4, kind: output, shape index: {}]  }
   0x1   :  { %v2126_v0 = vld [vmem:[%s2494_s0 + $0x10] sm:$0xff]  ;;  %v2131_v1 = vld [vmem:[%s2494_s0] sm:$0xff]  ;;  %1976 = vset.pattern.permute.xlu1 %v2089_v2  ;;  %1975 = vset.pattern.permute.xlu0 %v2089_v2  ;;  %v2138_v3 = vld [vmem:[%s2494_s0 + $0x18] sm:$0xff] }
   0x2   :  { %47 = vperm.xlu1 %1976, %v2126_v0   ;;  %41 = vperm.xlu0 %1975, %v2131_v1   ;;  %v2143_v4 = vld [vmem:[%s2494_s0 + $0x8] sm:$0xff]  ;;  %v18_v5 = vld [vmem:[%s2495_s1] sm:$0xff]  ;;  %v20_v7 = vld [vmem:[%s2495_s1 + $0x10] sm:$0xff] }
   0x3   :  { %v19_v6 = vld [vmem:[%s2495_s1 + $0x8] sm:$0xff]  ;;  %v21_v8 = vld [vmem:[%s2495_s1 + $0x18] sm:$0xff] }
   0x4   :  { %v1862_v9 = vpack.c.bf16 %v19_v6, %v18_v5 }
   0x5   :  { %9 = vsyncpa [#allocation3], 0  ;;  %v1866_v10 = vpack.c.bf16 %v21_v8, %v20_v7  ;;  %v2162_v11 = vld [vmem:[%s2494_s0 + $0x28] sm:$0xff]  ;;  %v2167_v12 = vld [vmem:[%s2494_s0 + $0x20] sm:$0xff]  ;;  %vm428_vm0 = vcmask 130048   ;;  %v38_v32 = vlaneseq  ;;  %vm280_vm1 = vcmask 261120  }
   0x6   :  { %50 = vperm.xlu1 %1976, %v2138_v3   ;;  %44 = vperm.xlu0 %1975, %v2143_v4   ;;  %v2174_v13 = vld [vmem:[%s2494_s0 + $0x38] sm:$0xff]  ;;  %v2179_v14 = vld [vmem:[%s2494_s0 + $0x30] sm:$0xff]  ;;  %v414_v15 = vld [vmem:[%s2497_s3 + $0x20] sm:$0xff]  ;;  %v2090_v36 = vmov 0.0   ;;  %s2091_s17 = smov 127   ;;  %s2093_s5 = smov 96  }
   0x7   :  { %1863 = vmatprep.subr.bf16.mxu0 %v1862_v9  ;;  %v415_v16 = vld [vmem:[%s2497_s3 + $0x28] sm:$0xff]  ;;  %v22_v17 = vld [vmem:[%s2496_s2] sm:$0xff]  ;;  %v2208_v22 = vld [vmem:[%s2497_s3 + $0x10] sm:$0xff]  ;;  %v2245_v33 = vand.u32 127, %v38_v32  ;;  %s2094_s6 = smov 64   ;;  %s2095_s10 = smov [#allocation2]  }
   0x8   :  { %1865 = vmatpush3.bf16.msra.mxu0 %v1862_v9  ;;  %v1870_v18 = vpack.c.bf16 %v415_v16, %v414_v15  ;;  %1716 = vmatprep.mubr.msk.f32.mxu1 %vm428_vm0, %v22_v17  ;;  %v2196_v19 = vld [vmem:[%s2497_s3] sm:$0xff]  ;;  %v2201_v20 = vld [vmem:[%s2497_s3 + $0x8] sm:$0xff]  ;;  %v2213_v23 = vld [vmem:[%s2497_s3 + $0x18] sm:$0xff]  ;;  %v2092_v15 = vmov 0   ;;  %s1503_s11 = sshll.u32 %s2095_s10, 4  ;;  %s1504_s11 = int_to_ptr.vmem [resolvable:$true] %s1503_s11 }
   0x9   :  { %1867 = vmatprep.subr.bf16.mxu0 %v1866_v10  ;;  %v1874_v21 = vpack.c.bf16 %v2201_v20, %v2196_v19  ;;  %v23_v24 = vld [vmem:[%s2496_s2 + $0x8] sm:$0xff]  ;;  %v24_v25 = vld [vmem:[%s2496_s2 + $0x10] sm:$0xff]  ;;  %v1878_v26 = vpack.c.bf16 %v2213_v23, %v2208_v22  ;;  %v25_v27 = vld [vmem:[%s2496_s2 + $0x18] sm:$0xff]  ;;  %p2070_p1 = scmp.lt.s32.totalorder %s1504_s11, %s1504_s11 }
   0xa   :  { %56 = vperm.xlu1 %1976, %v2162_v11   ;;  %53 = vperm.xlu0 %1975, %v2167_v12   ;;  %v26_v28 = vld [vmem:[%s2496_s2 + $0x20] sm:$0xff]  ;;  %v27_v29 = vld [vmem:[%s2496_s2 + $0x28] sm:$0xff]  ;;  %v28_v30 = vld [vmem:[%s2496_s2 + $0x30] sm:$0xff] }
   0xb   :  { %1871 = vmatprep.subr.bf16.mxu1 %v1870_v18  ;;  %v29_v31 = vld [vmem:[%s2496_s2 + $0x38] sm:$0xff]  ;;  %v2274_v51 = vld [vmem:[%s2497_s3 + $0x30] sm:$0xff]  ;;  %v2284_v53 = vld [vmem:[%s2497_s3 + $0x40] sm:$0xff] }
   0xc   :  { %1869 = vmatpush3.bf16.msra.mxu0 %v1866_v10  ;;  %1873 = vmatpush3.bf16.msra.mxu1 %v1870_v18  ;;  %v2279_v52 = vld [vmem:[%s2497_s3 + $0x38] sm:$0xff]  ;;  %v2293_v55 = vld [vmem:[%s2497_s3 + $0x48] sm:$0xff]  ;;  %v2300_v57 = vld [vmem:[%s2497_s3 + $0x50] sm:$0xff] }
   0xd   :  { %1875 = vmatprep.subr.bf16.mxu1 %v1874_v21  ;;  %v1882_v54 = vpack.c.bf16 %v2279_v52, %v2274_v51  ;;  %v1886_v56 = vpack.c.bf16 %v2293_v55, %v2284_v53  ;;  %v2305_v58 = vld [vmem:[%s2497_s3 + $0x58] sm:$0xff]  ;;  %v2326_v8 = vld [vmem:[%s2497_s3 + $0x60] sm:$0xff]  ;;  %v2331_v9 = vld [vmem:[%s2497_s3 + $0x68] sm:$0xff] }
   0xe   :  { %62 = vperm.xlu1 %1976, %v2174_v13   ;;  %59 = vperm.xlu0 %1975, %v2179_v14   ;;  %v1890_v59 = vpack.c.bf16 %v2305_v58, %v2300_v57  ;;  %v1894_v10 = vpack.c.bf16 %v2331_v9, %v2326_v8 }
   0xf   :  { %1717 = vmatmul.mubr.msk.f32.vlgmr.msra.gmra.mrb[0].mxu1 %vm428_vm0, %v23_v24  ;;  %1883 = vmatprep.subr.bf16.mxu0 %v1882_v54 }
  0x10   :  { %1877 = vmatpush3.bf16.msra.mxu1 %v1874_v21  ;;  %1719 = vmatprep.mubr.msk.f32.mxu1 %vm428_vm0, %v24_v25 }
  0x11   :  { %1879 = vmatprep.subr.bf16.mxu1 %v1878_v26 }
  0x12   :  { %122 = vrot.lane.b32.xlu1 %v2143_v4, %s2091_s17  ;;  %120 = vrot.lane.b32.xlu0 %v2131_v1, %s2091_s17 }
  0x13   :  { %1720 = vmatmul.mubr.msk.f32.gmra.mrb[2].mxu1 %vm428_vm0, %v25_v27  ;;  %1978 = vset.pattern.permute.xlu1 %v2092_v15 }
  0x14   :  { %1722 = vmatprep.mubr.msk.f32.mxu1 %vm428_vm0, %v26_v28  ;;  %1881 = vmatpush3.bf16.msra.mxu1 %v1878_v26 }
  0x15   :  { %1977 = vset.pattern.permute.xlu0 %v2092_v15 }
  0x16   :  { %124 = vrot.lane.b32.xlu0 %v2126_v0, %s2091_s17  ;;  %126 = vrot.lane.b32.xlu1 %v2138_v3, %s2091_s17 }
  0x17   :  { %1723 = vmatmul.mubr.msk.f32.gmra.mrb[4].mxu1 %vm428_vm0, %v27_v29 }
  0x18   :  { %1725 = vmatprep.mubr.msk.f32.mxu1 %vm428_vm0, %v28_v30 }
  0x1a   :  { %128 = vrot.lane.b32.xlu0 %v2167_v12, %s2091_s17  ;;  %130 = vrot.lane.b32.xlu1 %v2162_v11, %s2091_s17 }
  0x1b   :  { %1726 = vmatmul.mubr.msk.f32.gmra.mrb[6].mxu1 %vm428_vm0, %v29_v31 }
  0x1e   :  { %132 = vrot.lane.b32.xlu0 %v2179_v14, %s2091_s17  ;;  %134 = vrot.lane.b32.xlu1 %v2174_v13, %s2091_s17 }
  0x22   :  { %92 = vperm.xlu1 %1978, %v2143_v4   ;;  %89 = vperm.xlu0 %1977, %v2131_v1  }
  0x26   :  { %95 = vperm.xlu1 %1978, %v2126_v0   ;;  %104 = vperm.xlu0 %1977, %v2162_v11  }
  0x2a   :  { %98 = vperm.xlu1 %1978, %v2138_v3   ;;  %110 = vperm.xlu0 %1977, %v2174_v13  }
  0x2e   :  { %101 = vperm.xlu1 %1978, %v2167_v12  }
  0x32   :  { %107 = vperm.xlu1 %1978, %v2179_v14  }
  0x81   :  { %v48_v34 = vpop.permute.xlu1 %47  ;;  %v42_v35 = vpop.permute.xlu0 %41 }
  0x82   :  { %vm64_vm2 = vcmp.eq.s32.totalorder %v2245_v33, %v42_v35  ;;  %vm66_vm3 = vcmp.eq.s32.totalorder %v2245_v33, %v48_v34 }
  0x83   :  { %v1514_v37 = vsel %vm64_vm2, 1.0, %v2090_v36  ;;  %v1516_v40 = vsel %vm66_vm3, 1.0, %v2090_v36 }
  0x84   :  { %1700 = vmatprep.mubr.msk.f32.mxu0 %vm280_vm1, %v1514_v37 }
  0x85   :  { %v51_v38 = vpop.permute.xlu1 %50  ;;  %v45_v39 = vpop.permute.xlu0 %44 }
  0x86   :  { %vm65_vm4 = vcmp.eq.s32.totalorder %v2245_v33, %v45_v39  ;;  %vm67_vm5 = vcmp.eq.s32.totalorder %v2245_v33, %v51_v38 }
  0x87   :  { %v1515_v41 = vsel %vm65_vm4, 1.0, %v2090_v36  ;;  %v1517_v44 = vsel %vm67_vm5, 1.0, %v2090_v36 }
  0x88   :  { %1701 = vmatmul.mubr.msk.f32.vlgmr.msra.gmra.mrb[0].mxu0 %vm280_vm1, %v1515_v41 }
  0x89   :  { %v57_v42 = vpop.permute.xlu1 %56  ;;  %v54_v43 = vpop.permute.xlu0 %53  ;;  %1703 = vmatprep.mubr.msk.f32.mxu0 %vm280_vm1, %v1516_v40  ;;  %1885 = vmatpush3.bf16.msra.mxu0 %v1882_v54 }
  0x8a   :  { %vm68_vm6 = vcmp.eq.s32.totalorder %v2245_v33, %v54_v43  ;;  %vm69_vm7 = vcmp.eq.s32.totalorder %v2245_v33, %v57_v42  ;;  %1887 = vmatprep.subr.bf16.mxu0 %v1886_v56 }
  0x8b   :  { %v1518_v45 = vsel %vm68_vm6, 1.0, %v2090_v36  ;;  %v1519_v48 = vsel %vm69_vm7, 1.0, %v2090_v36 }
  0x8c   :  { %1704 = vmatmul.mubr.msk.f32.gmra.mrb[2].mxu0 %vm280_vm1, %v1517_v44 }
  0x8d   :  { %v63_v46 = vpop.permute.xlu1 %62  ;;  %v60_v47 = vpop.permute.xlu0 %59  ;;  %1706 = vmatprep.mubr.msk.f32.mxu0 %vm280_vm1, %v1518_v45  ;;  %1889 = vmatpush3.bf16.msra.mxu0 %v1886_v56 }
  0x8e   :  { %vm70_vm8 = vcmp.eq.s32.totalorder %v2245_v33, %v60_v47  ;;  %vm71_vm9 = vcmp.eq.s32.totalorder %v2245_v33, %v63_v46  ;;  %1891 = vmatprep.subr.bf16.mxu0 %v1890_v59 }
  0x8f   :  { %v1520_v49 = vsel %vm70_vm8, 1.0, %v2090_v36  ;;  %v1521_v50 = vsel %vm71_vm9, 1.0, %v2090_v36 }
  0x90   :  { %1707 = vmatmul.mubr.msk.f32.gmra.mrb[4].mxu0 %vm280_vm1, %v1519_v48 }
  0x91   :  { %1709 = vmatprep.mubr.msk.f32.mxu0 %vm280_vm1, %v1520_v49  ;;  %1893 = vmatpush3.bf16.msra.mxu0 %v1890_v59  ;;  %v121_v16 = vpop.permute.xlu0 %120  ;;  %v123_v17 = vpop.permute.xlu1 %122 }
  0x92   :  { %1895 = vmatprep.subr.bf16.mxu0 %v1894_v10  ;;  %vm209_vm10 = vcmp.lt.s32.totalorder %v2143_v4, %v123_v17  ;;  %vm208_vm12 = vcmp.lt.s32.totalorder %v2131_v1, %v121_v16  ;;  %vm136_vm14 = vcmp.gt.s32.totalorder %v2131_v1, %v121_v16  ;;  %vm137_vm0 = vcmp.gt.s32.totalorder %v2143_v4, %v123_v17 }
  0x93   :  { %v217_v21 = vsel %vm209_vm10, 1, %v2092_v15  ;;  %v216_v27 = vsel %vm208_vm12, 1, %v2092_v15  ;;  %v144_v30 = vsel %vm136_vm14, 1, %v2092_v15  ;;  %v145_v1 = vsel %vm137_vm0, 1, %v2092_v15 }
  0x94   :  { %1710 = vmatmul.mubr.msk.f32.gmra.mrb[6].mxu0 %vm280_vm1, %v1521_v50  ;;  %228 = vperm.xlu0 %1977, %v217_v21  }
  0x95   :  { %1897 = vmatpush3.bf16.msra.mxu0 %v1894_v10  ;;  %v125_v18 = vpop.permute.xlu0 %124  ;;  %v127_v24 = vpop.permute.xlu1 %126  ;;  %225 = vperm.xlu1 %1978, %v216_v27  }
  0x96   :  { %vm210_vm11 = vcmp.lt.s32.totalorder %v2126_v0, %v125_v18  ;;  %vm211_vm13 = vcmp.lt.s32.totalorder %v2138_v3, %v127_v24  ;;  %vm138_vm3 = vcmp.gt.s32.totalorder %v2126_v0, %v125_v18  ;;  %vm139_vm5 = vcmp.gt.s32.totalorder %v2138_v3, %v127_v24 }
  0x97   :  { %v218_v25 = vsel %vm210_vm11, 1, %v2092_v15  ;;  %v219_v28 = vsel %vm211_vm13, 1, %v2092_v15  ;;  %v146_v37 = vsel %vm138_vm3, 1, %v2092_v15  ;;  %v147_v39 = vsel %vm139_vm5, 1, %v2092_v15 }
  0x98   :  { %231 = vperm.xlu0 %1977, %v218_v25   ;;  %vm711_vm11 = vcmask 523264  }
  0x99   :  { %v129_v26 = vpop.permute.xlu0 %128  ;;  %v131_v29 = vpop.permute.xlu1 %130 }
  0x9a   :  { %vm212_vm15 = vcmp.lt.s32.totalorder %v2167_v12, %v129_v26  ;;  %vm213_vm2 = vcmp.lt.s32.totalorder %v2162_v11, %v131_v29  ;;  %vm140_vm7 = vcmp.gt.s32.totalorder %v2167_v12, %v129_v26  ;;  %vm141_vm8 = vcmp.gt.s32.totalorder %v2162_v11, %v131_v29  ;;  %v1562_v11 = vld [vmem:[%s2497_s3 + $0x70] ss:$0 sm:$0xff] }
  0x9b   :  { %v220_v31 = vsel %vm212_vm15, 1, %v2092_v15  ;;  %v221_v34 = vsel %vm213_vm2, 1, %v2092_v15  ;;  %v149_v0 = vsel %vm141_vm8, 1, %v2092_v15  ;;  %v148_v40 = vsel %vm140_vm7, 1, %v2092_v15 }
  0x9c   :  { %234 = vperm.xlu0 %1977, %v219_v28   ;;  %237 = vperm.xlu1 %1978, %v220_v31  }
  0x9d   :  { %v133_v32 = vpop.permute.xlu0 %132  ;;  %v135_v35 = vpop.permute.xlu1 %134 }
  0x9e   :  { %vm214_vm4 = vcmp.lt.s32.totalorder %v2179_v14, %v133_v32  ;;  %vm215_vm6 = vcmp.lt.s32.totalorder %v2174_v13, %v135_v35  ;;  %vm142_vm9 = vcmp.gt.s32.totalorder %v2179_v14, %v133_v32  ;;  %vm143_vm10 = vcmp.gt.s32.totalorder %v2174_v13, %v135_v35 }
  0x9f   :  { %v222_v4 = vsel %vm214_vm4, 1, %v2092_v15  ;;  %v223_v38 = vsel %vm215_vm6, 1, %v2092_v15  ;;  %v151_v3 = vsel %vm143_vm10, 1, %v2092_v15  ;;  %v150_v41 = vsel %vm142_vm9, 1, %v2092_v15  ;;  %v1563_v15 = vld [vmem:[%s2497_s3 + $0x71] ss:$0 sm:$0xff] }
  0xa0   :  { %153 = vperm.xlu0 %1977, %v144_v30   ;;  %156 = vperm.xlu1 %1978, %v145_v1  }
  0xa1   :  { %v2391_v17 = vpop.permute.xlu1 %92  ;;  %v90_v28 = vpop.permute.xlu0 %89 }
  0xa2   :  { %vm112_vm12 = vcmp.eq.s32.totalorder %v2245_v33, %v90_v28  ;;  %vm113_vm0 = vcmp.eq.s32.totalorder %v2245_v33, %v2391_v17 }
  0xa4   :  { %240 = vperm.xlu0 %1977, %v221_v34   ;;  %243 = vperm.xlu1 %1978, %v222_v4  }
  0xa5   :  { %v2393_v1 = vpop.permute.xlu1 %95 }
  0xa6   :  { %vm114_vm6 = vcmp.eq.s32.totalorder %v2245_v33, %v2393_v1 }
  0xa8   :  { %159 = vperm.xlu0 %1977, %v146_v37   ;;  %162 = vperm.xlu1 %1978, %v147_v39  }
  0xac   :  { %246 = vperm.xlu0 %1977, %v223_v38   ;;  %165 = vperm.xlu1 %1978, %v148_v40  }
  0xb0   :  { %168 = vperm.xlu0 %1977, %v149_v0   ;;  %171 = vperm.xlu1 %1978, %v150_v41   ;;  %v2396_v41 = vpop.permute.xlu0 %104 }
  0xb4   :  { %174 = vperm.xlu0 %1977, %v151_v3  }
 0x15b   :  { %v1702_v60 = vpop.f32.mrb[0].mxu0 }
 0x15c   :  { %v371_v61 = vpop.f32.mrb[1].mxu0 }
 0x15d   :  { %1736 = vmatprep.mubr.msk.f32.mxu1 %vm280_vm1, %v371_v61 }
 0x15e   :  { %1737 = vmatmul.mubr.msk.f32.vlgmr.msra.gmra.mrb[0].mxu1 %vm280_vm1, %v1702_v60 }
 0x15f   :  { %v1705_v62 = vpop.f32.mrb[2].mxu0 }
 0x160   :  { %v381_v63 = vpop.f32.mrb[3].mxu0 }
 0x161   :  { %1739 = vmatprep.mubr.msk.f32.mxu1 %vm280_vm1, %v381_v63 }
 0x162   :  { %1740 = vmatmul.mubr.msk.f32.gmra.mrb[2].mxu1 %vm280_vm1, %v1705_v62 }
 0x163   :  { %v1708_v2 = vpop.f32.mrb[4].mxu0 }
 0x164   :  { %v391_v5 = vpop.f32.mrb[5].mxu0 }
 0x165   :  { %1742 = vmatprep.mubr.msk.f32.mxu1 %vm280_vm1, %v391_v5 }
 0x166   :  { %1743 = vmatmul.mubr.msk.f32.gmra.mrb[4].mxu1 %vm280_vm1, %v1708_v2 }
 0x167   :  { %v1711_v6 = vpop.f32.mrb[6].mxu0 }
 0x168   :  { %v401_v7 = vpop.f32.mrb[7].mxu0 }
 0x169   :  { %1745 = vmatprep.mubr.msk.f32.mxu1 %vm280_vm1, %v401_v7 }
 0x16a   :  { %1746 = vmatmul.mubr.msk.f32.gmra.mrb[6].mxu1 %vm280_vm1, %v1711_v6 }
 0x231   :  { %v1738_v12 = vpop.f32.mrb[0].mxu1 }
 0x232   :  { %v692_v42 = vadd.f32 %v1738_v12, %v1562_v11  ;;  %v648_v43 = vpop.f32.mrb[1].mxu1 }
 0x233   :  { %v691_v44 = vadd.f32 %v1562_v11, %v648_v43  ;;  %v99_v43 = vpop.permute.xlu1 %98 }
 0x234   :  { %v700_v13 = vmax.f32 %v692_v42, 0.0 }
 0x235   :  { %v699_v14 = vmax.f32 %v691_v44, 0.0  ;;  %v1741_v45 = vpop.f32.mrb[2].mxu1 }
 0x236   :  { %v694_v46 = vadd.f32 %v1741_v45, %v1562_v11  ;;  %v658_v47 = vpop.f32.mrb[3].mxu1 }
 0x237   :  { %v693_v48 = vadd.f32 %v1562_v11, %v658_v47  ;;  %1764 = vmatprep.mubr.msk.f32.mxu0 %vm711_vm11, %v699_v14 }
 0x238   :  { %1765 = vmatmul.mubr.msk.f32.vlgmr.msra.gmra.mrb[8].mxu0 %vm711_vm11, %v700_v13  ;;  %v702_v54 = vmax.f32 %v694_v46, 0.0 }
 0x239   :  { %v701_v49 = vmax.f32 %v693_v48, 0.0  ;;  %v1744_v50 = vpop.f32.mrb[4].mxu1 }
 0x23a   :  { %v696_v56 = vadd.f32 %v1744_v50, %v1562_v11  ;;  %v668_v59 = vpop.f32.mrb[5].mxu1 }
 0x23b   :  { %v695_v60 = vadd.f32 %v1562_v11, %v668_v59  ;;  %1767 = vmatprep.mubr.msk.f32.mxu0 %vm711_vm11, %v701_v49  ;;  %v2400_v49 = vpop.permute.xlu0 %110 }
 0x23c   :  { %1768 = vmatmul.mubr.msk.f32.gmra.mrb[10].mxu0 %vm711_vm11, %v702_v54  ;;  %v704_v63 = vmax.f32 %v696_v56, 0.0  ;;  %v102_v56 = vpop.permute.xlu1 %101 }
 0x23d   :  { %v703_v61 = vmax.f32 %v695_v60, 0.0  ;;  %v1747_v62 = vpop.f32.mrb[6].mxu1 }
 0x23e   :  { %v698_v2 = vadd.f32 %v1747_v62, %v1562_v11  ;;  %v678_v5 = vpop.f32.mrb[7].mxu1 }
 0x23f   :  { %v697_v6 = vadd.f32 %v1562_v11, %v678_v5  ;;  %1770 = vmatprep.mubr.msk.f32.mxu0 %vm711_vm11, %v703_v61  ;;  %v229_v59 = vpop.permute.xlu0 %228 }
 0x240   :  { %1771 = vmatmul.mubr.msk.f32.gmra.mrb[12].mxu0 %vm711_vm11, %v704_v63  ;;  %v706_v10 = vmax.f32 %v698_v2, 0.0  ;;  %v2403_v60 = vpop.permute.xlu1 %107  ;;  %vm249_vm2 = vcmp.eq.s32.totalorder %v229_v59, 1 }
 0x241   :  { %v705_v7 = vmax.f32 %v697_v6, 0.0  ;;  %vm257_vm5 = vmand %vm113_vm0, %vm249_vm2  ;;  %vm116_vm2 = vcmp.eq.s32.totalorder %v2245_v33, %v102_v56 }
 0x242   :  { %v1531_v17 = vsel %vm257_vm5, 1.0, %v2090_v36 }
 0x243   :  { %1773 = vmatprep.mubr.msk.f32.mxu0 %vm711_vm11, %v705_v7  ;;  %v232_v61 = vpop.permute.xlu0 %231 }
 0x244   :  { %1774 = vmatmul.mubr.msk.f32.gmra.mrb[14].mxu0 %vm711_vm11, %v706_v10  ;;  %v226_v62 = vpop.permute.xlu1 %225  ;;  %vm250_vm7 = vcmp.eq.s32.totalorder %v232_v61, 1 }
 0x245   :  { %vm248_vm13 = vcmp.eq.s32.totalorder %v226_v62, 1  ;;  %vm258_vm10 = vmand %vm114_vm6, %vm250_vm7  ;;  %vm117_vm7 = vcmp.eq.s32.totalorder %v2245_v33, %v2396_v41  ;;  %v2035_v41 = vpack.i.bf16 %v2305_v58, %v2300_v57 }
 0x246   :  { %vm256_vm15 = vmand %vm112_vm12, %vm248_vm13  ;;  %v1532_v28 = vsel %vm258_vm10, 1.0, %v2090_v36 }
 0x247   :  { %v235_v63 = vpop.permute.xlu0 %234 }
 0x248   :  { %v238_v2 = vpop.permute.xlu1 %237  ;;  %vm251_vm13 = vcmp.eq.s32.totalorder %v235_v63, 1 }
 0x24b   :  { %v154_v5 = vpop.permute.xlu0 %153 }
 0x24c   :  { %v157_v6 = vpop.permute.xlu1 %156  ;;  %vm176_vm14 = vcmp.eq.s32.totalorder %v154_v5, 1 }
 0x24d   :  { %vm184_vm3 = vmand %vm112_vm12, %vm176_vm14  ;;  %vm177_vm4 = vcmp.eq.s32.totalorder %v157_v6, 1  ;;  %vm115_vm12 = vcmp.eq.s32.totalorder %v2245_v33, %v99_v43 }
 0x24e   :  { %vm185_vm8 = vmand %vm113_vm0, %vm177_vm4 }
 0x24f   :  { %v241_v7 = vpop.permute.xlu0 %240  ;;  %vm259_vm0 = vmand %vm115_vm12, %vm251_vm13  ;;  %vm118_vm13 = vcmp.eq.s32.totalorder %v2245_v33, %v2403_v60 }
 0x250   :  { %v244_v10 = vpop.permute.xlu1 %243 }
 0x30b   :  { %v1766_v16 = vpop.f32.mrb[8].mxu0 }
 0x30c   :  { %v808_v18 = vadd.f32 %v1766_v16, %v1563_v15  ;;  %v802_v21 = vpop.f32.mrb[9].mxu0  ;;  %v1522_v16 = vsel %vm184_vm3, 1.0, %v2090_v36  ;;  %vm252_vm3 = vcmp.eq.s32.totalorder %v238_v2, 1 }
 0x30d   :  { %v803_v24 = vadd.f32 %v1563_v15, %v802_v21 }
 0x30e   :  { %v842_v25 = vmax.f32 %v808_v18, 0.0  ;;  %v160_v18 = vpop.permute.xlu0 %159 }
 0x30f   :  { %v841_v26 = vmax.f32 %v803_v24, 0.0  ;;  %v1769_v27 = vpop.f32.mrb[10].mxu0  ;;  %vm178_vm9 = vcmp.eq.s32.totalorder %v160_v18, 1  ;;  %v163_v24 = vpop.permute.xlu1 %162 }
 0x310   :  { %v818_v29 = vadd.f32 %v1769_v27, %v1563_v15  ;;  %v812_v30 = vpop.f32.mrb[11].mxu0  ;;  %vm186_vm14 = vmand %vm114_vm6, %vm178_vm9 }
 0x311   :  { %v1979_v31 = vpack.i.bf16 %v842_v25, %v841_v26  ;;  %v1898_v32 = vpack.c.bf16 %v842_v25, %v841_v26  ;;  %v813_v34 = vadd.f32 %v1563_v15, %v812_v30  ;;  %v1523_v25 = vsel %vm185_vm8, 1.0, %v2090_v36  ;;  %vm260_vm6 = vmand %vm116_vm2, %vm252_vm3 }
 0x312   :  { %v844_v35 = vmax.f32 %v818_v29, 0.0  ;;  %v2001_v26 = vpack.i.bf16 %v1523_v25, %v1531_v17  ;;  %v247_v27 = vpop.permute.xlu0 %246  ;;  %v1524_v29 = vsel %vm186_vm14, 1.0, %v2090_v36  ;;  %vm253_vm8 = vcmp.eq.s32.totalorder %v241_v7, 1 }
 0x313   :  { %v843_v37 = vmax.f32 %v813_v34, 0.0  ;;  %v1772_v4 = vpop.f32.mrb[12].mxu0  ;;  %1980 = vrot.lane.b32.xlu1 %v1979_v31, %s2093_s5  ;;  %1899 = vmatprep.subr.bf16.mxu1 %v1898_v32  ;;  %v166_v30 = vpop.permute.xlu1 %165  ;;  %v2003_v31 = vpack.i.bf16 %v1524_v29, %v1532_v28  ;;  %vm254_vm14 = vcmp.eq.s32.totalorder %v244_v10, 1  ;;  %vm119_vm3 = vcmp.eq.s32.totalorder %v2245_v33, %v2400_v49 }
 0x314   :  { %v828_v38 = vadd.f32 %v1772_v4, %v1563_v15  ;;  %v822_v39 = vpop.f32.mrb[13].mxu0  ;;  %1901 = vmatpush3.bf16.msra.mxu1 %v1898_v32  ;;  %vm180_vm5 = vcmp.eq.s32.totalorder %v166_v30, 1  ;;  %v1533_v32 = vsel %vm259_vm0, 1.0, %v2090_v36  ;;  %v1534_v4 = vsel %vm260_vm6, 1.0, %v2090_v36 }
 0x315   :  { %v1984_v0 = vpack.i.bf16 %v844_v35, %v843_v37  ;;  %v1902_v40 = vpack.c.bf16 %v844_v35, %v843_v37  ;;  %v823_v3 = vadd.f32 %v1563_v15, %v822_v39  ;;  %vm188_vm9 = vmand %vm116_vm2, %vm180_vm5  ;;  %v2045_v33 = vpack.i.bf16 %v2279_v52, %v2274_v51 }
 0x316   :  { %v846_v11 = vmax.f32 %v828_v38, 0.0  ;;  %v169_v1 = vpop.permute.xlu0 %168  ;;  %v1526_v38 = vsel %vm188_vm9, 1.0, %v2090_v36  ;;  %vm262_vm2 = vmand %vm118_vm13, %vm254_vm14 }
 0x317   :  { %v845_v12 = vmax.f32 %v823_v3, 0.0  ;;  %1985 = vrot.lane.b32.xlu0 %v1984_v0, %s2093_s5  ;;  %v1775_v42 = vpop.f32.mrb[14].mxu0  ;;  %1903 = vmatprep.subr.bf16.mxu1 %v1902_v40  ;;  %vm181_vm10 = vcmp.eq.s32.totalorder %v169_v1, 1  ;;  %v172_v37 = vpop.permute.xlu1 %171  ;;  %v2007_v39 = vpack.i.bf16 %v1526_v38, %v1534_v4  ;;  %v2055_v1 = vpack.i.bf16 %v2201_v20, %v2196_v19 }
 0x318   :  { %v838_v44 = vadd.f32 %v1775_v42, %v1563_v15  ;;  %v832_v14 = vpop.f32.mrb[15].mxu0  ;;  %1905 = vmatpush3.bf16.msra.mxu1 %v1902_v40  ;;  %vm182_vm0 = vcmp.eq.s32.totalorder %v172_v37, 1  ;;  %v1536_v42 = vsel %vm262_vm2, 1.0, %v2090_v36 }
 0x319   :  { %v1989_v45 = vpack.i.bf16 %v846_v11, %v845_v12  ;;  %v1906_v13 = vpack.c.bf16 %v846_v11, %v845_v12  ;;  %v833_v46 = vadd.f32 %v1563_v15, %v832_v14  ;;  %v1530_v15 = vsel %vm256_vm15, 1.0, %v2090_v36  ;;  %vm190_vm5 = vmand %vm118_vm13, %vm182_vm0 }
 0x31a   :  { %v848_v47 = vmax.f32 %v838_v44, 0.0  ;;  %v1999_v21 = vpack.i.bf16 %v1522_v16, %v1530_v15  ;;  %vm179_vm15 = vcmp.eq.s32.totalorder %v163_v24, 1  ;;  %v175_v0 = vpop.permute.xlu0 %174  ;;  %v2040_v11 = vpack.i.bf16 %v2331_v9, %v2326_v8 }
 0x31b   :  { %v847_v48 = vmax.f32 %v833_v46, 0.0  ;;  %1990 = vrot.lane.b32.xlu1 %v1989_v45, %s2093_s5  ;;  %1907 = vmatprep.subr.bf16.mxu1 %v1906_v13  ;;  %vm187_vm4 = vmand %vm115_vm12, %vm179_vm15  ;;  %vm183_vm6 = vcmp.eq.s32.totalorder %v175_v0, 1  ;;  %v1528_v43 = vsel %vm190_vm5, 1.0, %v2090_v36  ;;  %v2050_v8 = vpack.i.bf16 %v2293_v55, %v2284_v53 }
 0x31c   :  { %1909 = vmatpush3.bf16.msra.mxu1 %v1906_v13  ;;  %v1525_v34 = vsel %vm187_vm4, 1.0, %v2090_v36  ;;  %vm261_vm12 = vmand %vm117_vm7, %vm253_vm8  ;;  %vm255_vm4 = vcmp.eq.s32.totalorder %v247_v27, 1  ;;  %v2011_v57 = vpack.i.bf16 %v1528_v43, %v1536_v42 }
 0x31d   :  { %v1994_v50 = vpack.i.bf16 %v848_v47, %v847_v48  ;;  %v1910_v54 = vpack.c.bf16 %v848_v47, %v847_v48  ;;  %v2005_v35 = vpack.i.bf16 %v1525_v34, %v1533_v32  ;;  %vm189_vm15 = vmand %vm117_vm7, %vm181_vm10  ;;  %v1535_v40 = vsel %vm261_vm12, 1.0, %v2090_v36 }
 0x31e   :  { %v1527_v3 = vsel %vm189_vm15, 1.0, %v2090_v36  ;;  %vm263_vm7 = vmand %vm119_vm3, %vm255_vm4 }
 0x31f   :  { %1995 = vrot.lane.b32.xlu0 %v1994_v50, %s2093_s5  ;;  %1911 = vmatprep.subr.bf16.mxu1 %v1910_v54  ;;  %v2009_v12 = vpack.i.bf16 %v1527_v3, %v1535_v40  ;;  %vm191_vm8 = vmand %vm119_vm3, %vm183_vm6  ;;  %v1537_v58 = vsel %vm263_vm7, 1.0, %v2090_v36 }
 0x320   :  { %1913 = vmatpush3.bf16.msra.mxu1 %v1910_v54  ;;  %v1529_v44 = vsel %vm191_vm8, 1.0, %v2090_v36 }
 0x321   :  { %v2013_v9 = vpack.i.bf16 %v1529_v44, %v1537_v58 }
 0x323   :  { %2036 = vrot.lane.b32.xlu0 %v2035_v41, %s2094_s6 }
 0x327   :  { %2041 = vrot.lane.b32.xlu0 %v2040_v11, %s2094_s6 }
 0x32b   :  { %2046 = vrot.lane.b32.xlu0 %v2045_v33, %s2094_s6 }
 0x32f   :  { %2051 = vrot.lane.b32.xlu0 %v2050_v8, %s2094_s6  ;;  %v1588_v8 = vld [vmem:[%s2497_s3 + $0x72] ss:$0 sm:$0xff] }
 0x333   :  { %2056 = vrot.lane.b32.xlu0 %v2055_v1, %s2094_s6 }
 0x344   :  { %2000 = vxpose.xlu1.b32.start [1/8] (short) (narrow) %v1999_v21, 32 }
 0x348   :  { %2002 = vxpose.xlu1.b32.cont [2/8] (short) (narrow) %v2001_v26, 32 }
 0x34c   :  { %2004 = vxpose.xlu1.b32.cont [3/8] (short) (narrow) %v2003_v31, 32 }
 0x350   :  { %2006 = vxpose.xlu1.b32.cont [4/8] (short) (narrow) %v2005_v35, 32  ;;  %v2060_v35 = vpack.i.bf16 %v2213_v23, %v2208_v22 }
 0x352   :  { %2061 = vrot.lane.b32.xlu0 %v2060_v35, %s2094_s6 }
 0x354   :  { %2008 = vxpose.xlu1.b32.cont [5/8] (short) (narrow) %v2007_v39, 32 }
 0x358   :  { %2010 = vxpose.xlu1.b32.cont [6/8] (short) (narrow) %v2009_v12, 32 }
 0x35c   :  { %2012 = vxpose.xlu1.b32.cont [7/8] (short) (narrow) %v2011_v57, 32 }
 0x360   :  { %2014 = vxpose.xlu1.b32.end [8/8] (short) (narrow) %v2013_v9, 32 }
 0x385   :  { %v1981_v14 = vpop.permute.xlu1 %1980 }
 0x386   :  { %v1983_v45 = vunpack.i.h.bf16 %v1981_v14  ;;  %v1982_v13 = vunpack.i.l.bf16 %v1981_v14 }
 0x388   :  { %v1914_v46 = vpack.c.bf16 %v1983_v45, %v1982_v13 }
 0x389   :  { %v1986_v51 = vpop.permute.xlu0 %1985 }
 0x38a   :  { %v1988_v52 = vunpack.i.h.bf16 %v1986_v51  ;;  %v1987_v47 = vunpack.i.l.bf16 %v1986_v51  ;;  %1915 = vmatprep.subr.bf16.mxu0 %v1914_v46 }
 0x38b   :  { %1917 = vmatpush3.bf16.msra.mxu0 %v1914_v46 }
 0x38c   :  { %v1918_v36 = vpack.c.bf16 %v1988_v52, %v1987_v47 }
 0x38d   :  { %v1991_v48 = vpop.permute.xlu1 %1990 }
 0x38e   :  { %v1993_v49 = vunpack.i.h.bf16 %v1991_v48  ;;  %v1992_v50 = vunpack.i.l.bf16 %v1991_v48  ;;  %1919 = vmatprep.subr.bf16.mxu0 %v1918_v36 }
 0x38f   :  { %1921 = vmatpush3.bf16.msra.mxu0 %v1918_v36 }
 0x390   :  { %v1922_v53 = vpack.c.bf16 %v1993_v49, %v1992_v50 }
 0x391   :  { %v1996_v55 = vpop.permute.xlu0 %1995 }
 0x392   :  { %v1998_v54 = vunpack.i.h.bf16 %v1996_v55  ;;  %v1997_v56 = vunpack.i.l.bf16 %v1996_v55  ;;  %1923 = vmatprep.subr.bf16.mxu0 %v1922_v53 }
 0x393   :  { %1925 = vmatpush3.bf16.msra.mxu0 %v1922_v53  ;;  %v1589_v53 = vld [vmem:[%s2497_s3 + $0x73] ss:$0 sm:$0xff]  ;;  %s2065_s3 = scalar_lea.vmem %s1504_s11, 512 }
 0x394   :  { %v1926_v59 = vpack.c.bf16 %v1998_v54, %v1997_v56  ;;  %p2066_p0 = scmp.ne.s32.totalorder %s1504_s11, %s2065_s3  ;;  %p2071_p2 = scmp.lt.s32.totalorder %s2065_s3, %s2065_s3 }
 0x395   :  { %v2037_v63 = vpop.permute.xlu0 %2036 }
 0x396   :  { %1927 = vmatprep.subr.bf16.mxu0 %v1926_v59  ;;  %v2039_v5 = vunpack.i.h.bf16 %v2037_v63  ;;  %v2038_v6 = vunpack.i.l.bf16 %v2037_v63  ;;  %p2072_p3 = por %p2071_p2, %p2070_p1 }
 0x397   :  { %1929 = vmatpush3.bf16.msra.mxu0 %v1926_v59 }
 0x398   :  { %v1930_v15 = vpack.c.bf16 %v2039_v5, %v2038_v6  ;;  %p2073_p4 = pnand %p2072_p3, %p2066_p0 }
 0x399   :  { %v2042_v16 = vpop.permute.xlu0 %2041 }
 0x39a   :  { %v2044_v21 = vunpack.i.h.bf16 %v2042_v16  ;;  %v2043_v24 = vunpack.i.l.bf16 %v2042_v16  ;;  %1931 = vmatprep.subr.bf16.mxu1 %v1930_v15 }
 0x39c   :  { %v1934_v26 = vpack.c.bf16 %v2044_v21, %v2043_v24 }
 0x39d   :  { %v2047_v27 = vpop.permute.xlu0 %2046 }
 0x39e   :  { %v2049_v29 = vunpack.i.h.bf16 %v2047_v27  ;;  %v2048_v30 = vunpack.i.l.bf16 %v2047_v27 }
 0x3a0   :  { %v1938_v34 = vpack.c.bf16 %v2049_v29, %v2048_v30 }
 0x3a1   :  { %v2052_v37 = vpop.permute.xlu0 %2051 }
 0x3a2   :  { %v2054_v4 = vunpack.i.h.bf16 %v2052_v37  ;;  %v2053_v38 = vunpack.i.l.bf16 %v2052_v37 }
 0x3a4   :  { %v1942_v41 = vpack.c.bf16 %v2054_v4, %v2053_v38 }
 0x3a5   :  { %v2057_v19 = vpop.permute.xlu0 %2056 }
 0x3a6   :  { %v2059_v22 = vunpack.i.h.bf16 %v2057_v19  ;;  %v2058_v23 = vunpack.i.l.bf16 %v2057_v19 }
 0x3a8   :  { %v1946_v43 = vpack.c.bf16 %v2059_v22, %v2058_v23 }
 0x3aa   :  { %1947 = vmatprep.subr.bf16.mxu0 %v1946_v43 }
 0x3c4   :  { %v2015_v60 = vpop.trf.xlu1  ;;  %v2062_v33 = vpop.permute.xlu0 %2061 }
 0x3c5   :  { %v2019_v61 = vunpack.i.h.bf16 %v2015_v60  ;;  %v2016_v62 = vunpack.i.l.bf16 %v2015_v60  ;;  %v2064_v57 = vunpack.i.h.bf16 %v2062_v33  ;;  %v2063_v58 = vunpack.i.l.bf16 %v2062_v33 }
 0x3c7   :  { %1792 = vmatprep.mubr.msk.f32.mxu1 %vm711_vm11, %v2019_v61  ;;  %1814 = vmatprep.mubr.msk.f32.mxu0 %vm711_vm11, %v2016_v62  ;;  %v1950_v44 = vpack.c.bf16 %v2064_v57, %v2063_v58 }
 0x3c8   :  { %v2020_v2 = vpop.trf.xlu1 }
 0x3c9   :  { %v2024_v7 = vunpack.i.h.bf16 %v2020_v2  ;;  %v2021_v10 = vunpack.i.l.bf16 %v2020_v2 }
 0x3cb   :  { %1793 = vmatmul.mubr.msk.f32.vlgmr.msra.gmra.mrb[8].mxu1 %vm711_vm11, %v2024_v7  ;;  %1815 = vmatmul.mubr.msk.f32.vlgmr.msra.gmra.mrb[16].mxu0 %vm711_vm11, %v2021_v10 }
 0x3cc   :  { %v2025_v18 = vpop.trf.xlu1  ;;  %1933 = vmatpush3.bf16.msra.mxu1 %v1930_v15  ;;  %1949 = vmatpush3.bf16.msra.mxu0 %v1946_v43 }
 0x3cd   :  { %v2029_v17 = vunpack.i.h.bf16 %v2025_v18  ;;  %v2026_v25 = vunpack.i.l.bf16 %v2025_v18  ;;  %1935 = vmatprep.subr.bf16.mxu1 %v1934_v26  ;;  %1951 = vmatprep.subr.bf16.mxu0 %v1950_v44 }
 0x3cf   :  { %1795 = vmatprep.mubr.msk.f32.mxu1 %vm711_vm11, %v2029_v17  ;;  %1817 = vmatprep.mubr.msk.f32.mxu0 %vm711_vm11, %v2026_v25 }
 0x3d0   :  { %v2030_v28 = vpop.trf.xlu1  ;;  %1937 = vmatpush3.bf16.msra.mxu1 %v1934_v26  ;;  %1953 = vmatpush3.bf16.msra.mxu0 %v1950_v44 }
 0x3d1   :  { %v2034_v31 = vunpack.i.h.bf16 %v2030_v28  ;;  %v2031_v32 = vunpack.i.l.bf16 %v2030_v28  ;;  %1939 = vmatprep.subr.bf16.mxu1 %v1938_v34 }
 0x3d3   :  { %1796 = vmatmul.mubr.msk.f32.gmra.mrb[10].mxu1 %vm711_vm11, %v2034_v31  ;;  %1818 = vmatmul.mubr.msk.f32.gmra.mrb[18].mxu0 %vm711_vm11, %v2031_v32 }
 0x49e   :  { %v1794_v39 = vpop.f32.mrb[8].mxu1  ;;  %v1816_v0 = vpop.f32.mrb[16].mxu0 }
 0x49f   :  { %v959_v40 = vpop.f32.mrb[9].mxu1  ;;  %v1120_v3 = vpop.f32.mrb[17].mxu0 }
 0x4a0   :  { %1828 = vmatprep.mubr.msk.f32.mxu1 %vm280_vm1, %v1120_v3 }
 0x4a1   :  { %1829 = vmatmul.mubr.msk.f32.vlgmr.msra.gmra.mrb[12].mxu1 %vm280_vm1, %v1816_v0 }
 0x4a2   :  { %1941 = vmatpush3.bf16.msra.mxu1 %v1938_v34 }
 0x4a3   :  { %1943 = vmatprep.subr.bf16.mxu1 %v1942_v41 }
 0x4a6   :  { %v1797_v20 = vpop.f32.mrb[10].mxu1  ;;  %v1819_v11 = vpop.f32.mrb[18].mxu0  ;;  %1945 = vmatpush3.bf16.msra.mxu1 %v1942_v41 }
 0x4a7   :  { %v969_v12 = vpop.f32.mrb[11].mxu1  ;;  %v1130_v42 = vpop.f32.mrb[19].mxu0 }
 0x4a8   :  { %1831 = vmatprep.mubr.msk.f32.mxu1 %vm280_vm1, %v1130_v42 }
 0x4a9   :  { %1832 = vmatmul.mubr.msk.f32.gmra.mrb[14].mxu1 %vm280_vm1, %v1819_v11 }
 0x4aa   :  { %1842 = vmatprep.mubr.msk.f32.mxu1 %vm280_vm1, %v959_v40 }
 0x4ad   :  { %1843 = vmatmul.mubr.msk.f32.vlgmr.msra.gmra.mrb[12].mxu1 %vm280_vm1, %v1794_v39 }
 0x4ae   :  { %1845 = vmatprep.mubr.msk.f32.mxu1 %vm280_vm1, %v969_v12 }
 0x4b1   :  { %1846 = vmatmul.mubr.msk.f32.gmra.mrb[14].mxu1 %vm280_vm1, %v1797_v20 }
 0x580   :  { %v1844_v9 = vpop.f32.mrb[12].mxu1 }
 0x581   :  { %v1370_v14 = vadd.f32 %v1844_v9, %v1588_v8  ;;  %v1346_v45 = vpop.f32.mrb[13].mxu1 }
 0x582   :  { %v1369_v13 = vadd.f32 %v1588_v8, %v1346_v45 }
 0x583   :  { %v1374_v52 = vmax.f32 %v1370_v14, 0.0 }
 0x584   :  { %v1373_v46 = vmax.f32 %v1369_v13, 0.0  ;;  %v1847_v51 = vpop.f32.mrb[14].mxu1 }
 0x585   :  { %v1372_v47 = vadd.f32 %v1847_v51, %v1588_v8  ;;  %v1356_v36 = vpop.f32.mrb[15].mxu1 }
 0x586   :  { %v1371_v48 = vadd.f32 %v1588_v8, %v1356_v36  ;;  %1856 = vmatprep.mubr.msk.f32.mxu0 %vm280_vm1, %v1373_v46 }
 0x587   :  { %1857 = vmatmul.mubr.msk.f32.vlgmr.msra.gmra.mrb[20].mxu0 %vm280_vm1, %v1374_v52  ;;  %v1376_v50 = vmax.f32 %v1372_v47, 0.0 }
 0x588   :  { %v1375_v49 = vmax.f32 %v1371_v48, 0.0 }
 0x58a   :  { %1859 = vmatprep.mubr.msk.f32.mxu0 %vm280_vm1, %v1375_v49 }
 0x58b   :  { %1860 = vmatmul.mubr.msk.f32.gmra.mrb[22].mxu0 %vm280_vm1, %v1376_v50 }
 0x65a   :  { %v1858_v55 = vpop.f32.mrb[20].mxu0 }
 0x65b   :  { %v1481_v54 = vadd.f32 %v1858_v55, %v1589_v53  ;;  %v1475_v56 = vpop.f32.mrb[21].mxu0 }
 0x65c   :  { %v1476_v59 = vadd.f32 %v1589_v53, %v1475_v56 }
 0x65d   :  { %1495 = vst.msk [vmem:[#allocation2 + $0x8] sm:$0xff] %vm280_vm1, %v1481_v54 }
 0x65e   :  { %1494 = vst.msk [vmem:[#allocation2] sm:$0xff] %vm280_vm1, %v1476_v59  ;;  %v1861_v60 = vpop.f32.mrb[22].mxu0 }
 0x65f   :  { %v1491_v61 = vadd.f32 %v1861_v60, %v1589_v53  ;;  %v1485_v62 = vpop.f32.mrb[23].mxu0 }
 0x660   :  { %v1486_v63 = vadd.f32 %v1589_v53, %v1485_v62 }
 0x661   :  { %1497 = vst.msk [vmem:[#allocation2 + $0x18] sm:$0xff] %vm280_vm1, %v1491_v61 }
 0x662   :  { %1496 = vst.msk [vmem:[#allocation2 + $0x10] sm:$0xff] %vm280_vm1, %v1486_v63 }
 0x663   :  { %2076 = shalt.err (!%p2073_p4)
}
 0x664   :  { %s2077_s13 = scalar_lea.hbm %s2498_s4, 512 }
 0x665   :  { %p2078_p5 = scmp.ne.s32.totalorder %s2498_s4, %s2077_s13  ;;  %p2081_p6 = scmp.lt.u32.totalorder %s2077_s13, %s2498_s4 }
 0x667   :  { %p2083_p7 = pnand %p2081_p6, %p2078_p5 }
 0x669   :  { %2086 = shalt.err (!%p2083_p7)
}
 0x66a   :  { %s2096_s0 = smov 128   ;;  %s2097_s18 = smov 8  }
 0x66b   :  { %1509 = dma.vmem_to_hbm [thread:$0]  %s1504_s11, 512, %s2498_s4, [#allocation3], %s2096_s0, %s2096_s0, %s2097_s18  }
 0x66c   :  { %2087 = dma.done.wait [#allocation3], 512  }
 0x66d   :  { %2088 = vsyncadd [#allocation3], 4294966784 }
 0x66e   :  { %1513 = vsyncpa [#allocation3], 1 }

</bundles_post_ra>
